<compile_context>
chip_gen: v6e
topology: v6e:2x2x1
jax: 0.10.0
libtpu: 0.0.40
codegen_flags: <defaults>
</compile_context>

<pallas_src>
import jax
import jax.numpy as jnp
from jax import lax
from jax.experimental import pallas as pl
from jax.experimental.pallas import tpu as pltpu


def _round_up(n, m):
    return ((n + m - 1) // m) * m


def _pad_axis(a, axis, target):
    pad = target - a.shape[axis]
    if pad <= 0:
        return a
    widths = [(0, 0)] * a.ndim
    widths[axis] = (0, pad)
    return jnp.pad(a, widths)


def rnn_kernel(emb_ref, wih_ref, whh_ref, b_ref, wfc_ref, bfc_ref,
               out_ref, xproj_ref, h_ref):
    """Vanilla tanh RNN over time + final linear head (all tiles padded dense).

    emb_ref  : (T, Bp, Ep) f32   time-major embedded sequence (padded)
    wih_ref  : (Ep, Hp)    f32   input->hidden  (transposed, zero-padded)
    whh_ref  : (Hp, Hp)    f32   hidden->hidden (transposed, zero-padded)
    b_ref    : (1, Hp)     f32   fused b_ih + b_hh (zero-padded)
    wfc_ref  : (Hp, Op)    f32   final linear   (transposed, zero-padded)
    bfc_ref  : (1, Op)     f32   (zero-padded)
    out_ref  : (Bp, Op)    f32
    xproj_ref: (T, Bp, Hp) f32   scratch: hoisted input projection
    h_ref    : (Bp, Hp)    f32   scratch: recurrent hidden state
    """
    T, Bp, Ep = emb_ref.shape
    Hp = whh_ref.shape[0]

    # Hoisted input projection for all timesteps + fused RNN bias (one big
    # MXU matmul instead of T tiny ones inside the serial recurrence).
    x_all = emb_ref[...].reshape(T * Bp, Ep)
    xproj = (jnp.dot(x_all, wih_ref[...], preferred_element_type=jnp.float32)
             + b_ref[...])
    xproj_ref[...] = xproj.reshape(T, Bp, Hp)

    # Keep W_hh resident in vregs across the whole (unrolled) recurrence.
    whh = whh_ref[...]

    # h_0 = zeros (matches torch.zeros(1, B, H)); padded lanes stay exactly 0.
    h_ref[...] = jnp.zeros_like(h_ref)

    def step(t, carry):
        pre = xproj_ref[t] + jnp.dot(h_ref[...], whh,
                                     preferred_element_type=jnp.float32)
        h_ref[...] = jnp.tanh(pre)
        return carry

    # T is static and small: fully unroll so the recurrence is visible to the
    # instruction scheduler.
    lax.fori_loop(0, T, step, 0, unroll=True)

    # fc on the last hidden state; lane-dense (Bp, Op) store.
    out_ref[...] = (jnp.dot(h_ref[...], wfc_ref[...],
                            preferred_element_type=jnp.float32)
                    + bfc_ref[...])


def rnn_forward(x, params):
    """x: (B, T) int32 token ids.  Returns (B, output_size) float32."""
    B, T = x.shape
    E = params["emb"].shape[1]
    H = params["w_hh"].shape[0]
    O = params["w_fc"].shape[0]

    # Pad to (8, 128)-dense tiles; zero padding keeps the real outputs exact.
    Bp = _round_up(B, 8)
    Ep = _round_up(E, 128)
    Hp = _round_up(H, 128)
    Op = _round_up(O, 128)

    # Time-major embedding gather directly (no extra HBM transpose pass).
    emb_tab = _pad_axis(params["emb"].astype(jnp.float32), 1, Ep)      # (V, Ep)
    emb_tm = jnp.take(emb_tab, x.T, axis=0)                            # (T, B, Ep)
    emb_tm = _pad_axis(emb_tm, 1, Bp)                                  # (T, Bp, Ep)

    wih_t = _pad_axis(_pad_axis(params["w_ih"].T.astype(jnp.float32), 0, Ep), 1, Hp)
    whh_t = _pad_axis(_pad_axis(params["w_hh"].T.astype(jnp.float32), 0, Hp), 1, Hp)
    wfc_t = _pad_axis(_pad_axis(params["w_fc"].T.astype(jnp.float32), 0, Hp), 1, Op)
    b_rnn = _pad_axis((params["b_ih"] + params["b_hh"])
                      .astype(jnp.float32).reshape(1, H), 1, Hp)        # fused bias
    b_fc = _pad_axis(params["b_fc"].astype(jnp.float32).reshape(1, O), 1, Op)

    out_p = pl.pallas_call(
        rnn_kernel,
        out_shape=jax.ShapeDtypeStruct((Bp, Op), jnp.float32),
        in_specs=[pl.BlockSpec(memory_space=pltpu.MemorySpace.VMEM)] * 6,
        out_specs=pl.BlockSpec(memory_space=pltpu.MemorySpace.VMEM),
        scratch_shapes=[pltpu.VMEM((T, Bp, Hp), jnp.float32),
                        pltpu.VMEM((Bp, Hp), jnp.float32)],
    )(emb_tm, wih_t, whh_t, b_rnn, wfc_t, b_fc)

    # Slice the real batch rows / output columns back out.
    return out_p[:B, :O]


def make_params(key, vocab_size, emb_size, hidden_size, output_size, pad_idx):
    ks = jax.random.split(key, 7)
    bound = 1.0 / jnp.sqrt(hidden_size)
    emb = jax.random.normal(ks[0], (vocab_size, emb_size), jnp.float32)
    emb = emb.at[pad_idx].set(0.0)                          # padding_idx => zero row
    params = {
        "emb":  emb,
        "w_ih": jax.random.uniform(ks[1], (hidden_size, emb_size), jnp.float32,
                                   -bound, bound),
        "w_hh": jax.random.uniform(ks[2], (hidden_size, hidden_size), jnp.float32,
                                   -bound, bound),
        "b_ih": jax.random.uniform(ks[3], (hidden_size,), jnp.float32, -bound, bound),
        "b_hh": jax.random.uniform(ks[4], (hidden_size,), jnp.float32, -bound, bound),
        "w_fc": jax.random.uniform(ks[5], (output_size, hidden_size), jnp.float32,
                                   -bound, bound),
        "b_fc": jax.random.uniform(ks[6], (output_size,), jnp.float32, -bound, bound),
    }
    return params


def rnn_forward_ref(x, params):
    """Pure-JAX reference reproducing the PyTorch forward, for sanity checking."""
    emb = jnp.take(params["emb"], x, axis=0)                # (B, T, E)
    B, T, _ = emb.shape
    H = params["w_hh"].shape[0]
    h = jnp.zeros((B, H), jnp.float32)
    for t in range(T):
        h = jnp.tanh(emb[:, t, :] @ params["w_ih"].T + params["b_ih"]
                     + h @ params["w_hh"].T + params["b_hh"])
    return h @ params["w_fc"].T + params["b_fc"]


if __name__ == "__main__":
    # Small shapes consistent with the module's forward: x is (batch, seq) token ids.
    batch, seq = 2, 8
    vocab_size, emb_size, hidden_size, output_size, pad_idx = 64, 32, 32, 4, 0

    key = jax.random.PRNGKey(0)
    pkey, xkey = jax.random.split(key)
    params = make_params(pkey, vocab_size, emb_size, hidden_size, output_size, pad_idx)

    x = jax.random.randint(xkey, (batch, seq), 0, vocab_size, dtype=jnp.int32)

    out = jax.block_until_ready(rnn_forward(x, params))

    ref = rnn_forward_ref(x, params)
    assert out.shape == (batch, output_size)
    assert jnp.allclose(out, ref, atol=1e-5, rtol=1e-5), "mismatch vs reference"

    print("KERNEL_OK")
</pallas_src>

<mosaic_0001>
module attributes {stable_mosaic.version = 11 : i64} {
  func.func @rnn_kernel(%arg0: memref<8x8x128xf32, #tpu.memory_space<vmem>>, %arg1: memref<128x128xf32, #tpu.memory_space<vmem>>, %arg2: memref<128x128xf32, #tpu.memory_space<vmem>>, %arg3: memref<1x128xf32, #tpu.memory_space<vmem>>, %arg4: memref<128x128xf32, #tpu.memory_space<vmem>>, %arg5: memref<1x128xf32, #tpu.memory_space<vmem>>, %arg6: memref<8x128xf32, #tpu.memory_space<vmem>>, %arg7: memref<8x8x128xf32, #tpu.memory_space<vmem>>, %arg8: memref<8x128xf32, #tpu.memory_space<vmem>>) attributes {dimension_semantics = [], scalar_prefetch = 0 : i64, scratch_operands = 2 : i64, tpu.core_type = #tpu.core_type<tc>} {
    %c0 = arith.constant 0 : index
    %c0_0 = arith.constant 0 : index
    %c0_1 = arith.constant 0 : index
    %0 = vector.load %arg0[%c0, %c0_0, %c0_1] : memref<8x8x128xf32, #tpu.memory_space<vmem>>, vector<8x8x128xf32>
    %1 = vector.shape_cast %0 : vector<8x8x128xf32> to vector<64x128xf32>
    %c0_2 = arith.constant 0 : index
    %c0_3 = arith.constant 0 : index
    %2 = vector.load %arg1[%c0_2, %c0_3] : memref<128x128xf32, #tpu.memory_space<vmem>>, vector<128x128xf32>
    %cst = arith.constant dense<0.000000e+00> : vector<64x128xf32>
    %3 = tpu.matmul %1, %2, %cst {dimension_numbers = #tpu.dot_dimension_numbers<[1], [0], [0], [1], [0, 0, 1, 1], [], []>} : vector<64x128xf32>, vector<128x128xf32>, vector<64x128xf32> -> vector<64x128xf32>
    %c0_4 = arith.constant 0 : index
    %c0_5 = arith.constant 0 : index
    %4 = vector.load %arg3[%c0_4, %c0_5] : memref<1x128xf32, #tpu.memory_space<vmem>>, vector<1x128xf32>
    %5 = vector.broadcast %4 : vector<1x128xf32> to vector<64x128xf32>
    %6 = arith.addf %3, %5 : vector<64x128xf32>
    %7 = vector.shape_cast %6 : vector<64x128xf32> to vector<8x8x128xf32>
    %c0_6 = arith.constant 0 : index
    %c0_7 = arith.constant 0 : index
    %c0_8 = arith.constant 0 : index
    %8 = vector.load %arg7[%c0_6, %c0_7, %c0_8] : memref<8x8x128xf32, #tpu.memory_space<vmem>>, vector<8x8x128xf32>
    tpu.vector_store %arg7[%c0_6, %c0_7, %c0_8], %7 {strides = array<i32>} : memref<8x8x128xf32, #tpu.memory_space<vmem>>, vector<8x8x128xf32>,
    %c0_9 = arith.constant 0 : index
    %c0_10 = arith.constant 0 : index
    %9 = vector.load %arg2[%c0_9, %c0_10] : memref<128x128xf32, #tpu.memory_space<vmem>>, vector<128x128xf32>
    %cst_11 = arith.constant 0.000000e+00 : f32
    %10 = vector.broadcast %cst_11 : f32 to vector<8x128xf32>
    %c0_12 = arith.constant 0 : index
    %c0_13 = arith.constant 0 : index
    %11 = vector.load %arg8[%c0_12, %c0_13] : memref<8x128xf32, #tpu.memory_space<vmem>>, vector<8x128xf32>
    tpu.vector_store %arg8[%c0_12, %c0_13], %10 {strides = array<i32>} : memref<8x128xf32, #tpu.memory_space<vmem>>, vector<8x128xf32>,
    %c0_i32 = arith.constant 0 : i32
    %12 = arith.index_cast %c0_i32 : i32 to index
    %c0_14 = arith.constant 0 : index
    %c0_15 = arith.constant 0 : index
    %13 = vector.load %arg7[%12, %c0_14, %c0_15] : memref<8x8x128xf32, #tpu.memory_space<vmem>>, vector<1x8x128xf32>
    %14 = vector.shape_cast %13 : vector<1x8x128xf32> to vector<8x128xf32>
    %c0_16 = arith.constant 0 : index
    %c0_17 = arith.constant 0 : index
    %15 = vector.load %arg8[%c0_16, %c0_17] : memref<8x128xf32, #tpu.memory_space<vmem>>, vector<8x128xf32>
    %cst_18 = arith.constant dense<0.000000e+00> : vector<8x128xf32>
    %16 = tpu.matmul %15, %9, %cst_18 {dimension_numbers = #tpu.dot_dimension_numbers<[1], [0], [0], [1], [0, 0, 1, 1], [], []>} : vector<8x128xf32>, vector<128x128xf32>, vector<8x128xf32> -> vector<8x128xf32>
    %17 = arith.addf %14, %16 : vector<8x128xf32>
    %18 = math.tanh %17 : vector<8x128xf32>
    %c0_19 = arith.constant 0 : index
    %c0_20 = arith.constant 0 : index
    %19 = vector.load %arg8[%c0_19, %c0_20] : memref<8x128xf32, #tpu.memory_space<vmem>>, vector<8x128xf32>
    tpu.vector_store %arg8[%c0_19, %c0_20], %18 {strides = array<i32>} : memref<8x128xf32, #tpu.memory_space<vmem>>, vector<8x128xf32>,
    %c1_i32 = arith.constant 1 : i32
    %20 = arith.index_cast %c1_i32 : i32 to index
    %c0_21 = arith.constant 0 : index
    %c0_22 = arith.constant 0 : index
    %21 = vector.load %arg7[%20, %c0_21, %c0_22] : memref<8x8x128xf32, #tpu.memory_space<vmem>>, vector<1x8x128xf32>
    %22 = vector.shape_cast %21 : vector<1x8x128xf32> to vector<8x128xf32>
    %c0_23 = arith.constant 0 : index
    %c0_24 = arith.constant 0 : index
    %23 = vector.load %arg8[%c0_23, %c0_24] : memref<8x128xf32, #tpu.memory_space<vmem>>, vector<8x128xf32>
    %cst_25 = arith.constant dense<0.000000e+00> : vector<8x128xf32>
    %24 = tpu.matmul %23, %9, %cst_25 {dimension_numbers = #tpu.dot_dimension_numbers<[1], [0], [0], [1], [0, 0, 1, 1], [], []>} : vector<8x128xf32>, vector<128x128xf32>, vector<8x128xf32> -> vector<8x128xf32>
    %25 = arith.addf %22, %24 : vector<8x128xf32>
    %26 = math.tanh %25 : vector<8x128xf32>
    %c0_26 = arith.constant 0 : index
    %c0_27 = arith.constant 0 : index
    %27 = vector.load %arg8[%c0_26, %c0_27] : memref<8x128xf32, #tpu.memory_space<vmem>>, vector<8x128xf32>
    tpu.vector_store %arg8[%c0_26, %c0_27], %26 {strides = array<i32>} : memref<8x128xf32, #tpu.memory_space<vmem>>, vector<8x128xf32>,
    %c2_i32 = arith.constant 2 : i32
    %28 = arith.index_cast %c2_i32 : i32 to index
    %c0_28 = arith.constant 0 : index
    %c0_29 = arith.constant 0 : index
    %29 = vector.load %arg7[%28, %c0_28, %c0_29] : memref<8x8x128xf32, #tpu.memory_space<vmem>>, vector<1x8x128xf32>
    %30 = vector.shape_cast %29 : vector<1x8x128xf32> to vector<8x128xf32>
    %c0_30 = arith.constant 0 : index
    %c0_31 = arith.constant 0 : index
    %31 = vector.load %arg8[%c0_30, %c0_31] : memref<8x128xf32, #tpu.memory_space<vmem>>, vector<8x128xf32>
    %cst_32 = arith.constant dense<0.000000e+00> : vector<8x128xf32>
    %32 = tpu.matmul %31, %9, %cst_32 {dimension_numbers = #tpu.dot_dimension_numbers<[1], [0], [0], [1], [0, 0, 1, 1], [], []>} : vector<8x128xf32>, vector<128x128xf32>, vector<8x128xf32> -> vector<8x128xf32>
    %33 = arith.addf %30, %32 : vector<8x128xf32>
    %34 = math.tanh %33 : vector<8x128xf32>
    %c0_33 = arith.constant 0 : index
    %c0_34 = arith.constant 0 : index
    %35 = vector.load %arg8[%c0_33, %c0_34] : memref<8x128xf32, #tpu.memory_space<vmem>>, vector<8x128xf32>
    tpu.vector_store %arg8[%c0_33, %c0_34], %34 {strides = array<i32>} : memref<8x128xf32, #tpu.memory_space<vmem>>, vector<8x128xf32>,
    %c3_i32 = arith.constant 3 : i32
    %36 = arith.index_cast %c3_i32 : i32 to index
    %c0_35 = arith.constant 0 : index
    %c0_36 = arith.constant 0 : index
    %37 = vector.load %arg7[%36, %c0_35, %c0_36] : memref<8x8x128xf32, #tpu.memory_space<vmem>>, vector<1x8x128xf32>
    %38 = vector.shape_cast %37 : vector<1x8x128xf32> to vector<8x128xf32>
    %c0_37 = arith.constant 0 : index
    %c0_38 = arith.constant 0 : index
    %39 = vector.load %arg8[%c0_37, %c0_38] : memref<8x128xf32, #tpu.memory_space<vmem>>, vector<8x128xf32>
    %cst_39 = arith.constant dense<0.000000e+00> : vector<8x128xf32>
    %40 = tpu.matmul %39, %9, %cst_39 {dimension_numbers = #tpu.dot_dimension_numbers<[1], [0], [0], [1], [0, 0, 1, 1], [], []>} : vector<8x128xf32>, vector<128x128xf32>, vector<8x128xf32> -> vector<8x128xf32>
    %41 = arith.addf %38, %40 : vector<8x128xf32>
    %42 = math.tanh %41 : vector<8x128xf32>
    %c0_40 = arith.constant 0 : index
    %c0_41 = arith.constant 0 : index
    %43 = vector.load %arg8[%c0_40, %c0_41] : memref<8x128xf32, #tpu.memory_space<vmem>>, vector<8x128xf32>
    tpu.vector_store %arg8[%c0_40, %c0_41], %42 {strides = array<i32>} : memref<8x128xf32, #tpu.memory_space<vmem>>, vector<8x128xf32>,
    %c4_i32 = arith.constant 4 : i32
    %44 = arith.index_cast %c4_i32 : i32 to index
    %c0_42 = arith.constant 0 : index
    %c0_43 = arith.constant 0 : index
    %45 = vector.load %arg7[%44, %c0_42, %c0_43] : memref<8x8x128xf32, #tpu.memory_space<vmem>>, vector<1x8x128xf32>
    %46 = vector.shape_cast %45 : vector<1x8x128xf32> to vector<8x128xf32>
    %c0_44 = arith.constant 0 : index
    %c0_45 = arith.constant 0 : index
    %47 = vector.load %arg8[%c0_44, %c0_45] : memref<8x128xf32, #tpu.memory_space<vmem>>, vector<8x128xf32>
    %cst_46 = arith.constant dense<0.000000e+00> : vector<8x128xf32>
    %48 = tpu.matmul %47, %9, %cst_46 {dimension_numbers = #tpu.dot_dimension_numbers<[1], [0], [0], [1], [0, 0, 1, 1], [], []>} : vector<8x128xf32>, vector<128x128xf32>, vector<8x128xf32> -> vector<8x128xf32>
    %49 = arith.addf %46, %48 : vector<8x128xf32>
    %50 = math.tanh %49 : vector<8x128xf32>
    %c0_47 = arith.constant 0 : index
    %c0_48 = arith.constant 0 : index
    %51 = vector.load %arg8[%c0_47, %c0_48] : memref<8x128xf32, #tpu.memory_space<vmem>>, vector<8x128xf32>
    tpu.vector_store %arg8[%c0_47, %c0_48], %50 {strides = array<i32>} : memref<8x128xf32, #tpu.memory_space<vmem>>, vector<8x128xf32>,
    %c5_i32 = arith.constant 5 : i32
    %52 = arith.index_cast %c5_i32 : i32 to index
    %c0_49 = arith.constant 0 : index
    %c0_50 = arith.constant 0 : index
    %53 = vector.load %arg7[%52, %c0_49, %c0_50] : memref<8x8x128xf32, #tpu.memory_space<vmem>>, vector<1x8x128xf32>
    %54 = vector.shape_cast %53 : vector<1x8x128xf32> to vector<8x128xf32>
    %c0_51 = arith.constant 0 : index
    %c0_52 = arith.constant 0 : index
    %55 = vector.load %arg8[%c0_51, %c0_52] : memref<8x128xf32, #tpu.memory_space<vmem>>, vector<8x128xf32>
    %cst_53 = arith.constant dense<0.000000e+00> : vector<8x128xf32>
    %56 = tpu.matmul %55, %9, %cst_53 {dimension_numbers = #tpu.dot_dimension_numbers<[1], [0], [0], [1], [0, 0, 1, 1], [], []>} : vector<8x128xf32>, vector<128x128xf32>, vector<8x128xf32> -> vector<8x128xf32>
    %57 = arith.addf %54, %56 : vector<8x128xf32>
    %58 = math.tanh %57 : vector<8x128xf32>
    %c0_54 = arith.constant 0 : index
    %c0_55 = arith.constant 0 : index
    %59 = vector.load %arg8[%c0_54, %c0_55] : memref<8x128xf32, #tpu.memory_space<vmem>>, vector<8x128xf32>
    tpu.vector_store %arg8[%c0_54, %c0_55], %58 {strides = array<i32>} : memref<8x128xf32, #tpu.memory_space<vmem>>, vector<8x128xf32>,
    %c6_i32 = arith.constant 6 : i32
    %60 = arith.index_cast %c6_i32 : i32 to index
    %c0_56 = arith.constant 0 : index
    %c0_57 = arith.constant 0 : index
    %61 = vector.load %arg7[%60, %c0_56, %c0_57] : memref<8x8x128xf32, #tpu.memory_space<vmem>>, vector<1x8x128xf32>
    %62 = vector.shape_cast %61 : vector<1x8x128xf32> to vector<8x128xf32>
    %c0_58 = arith.constant 0 : index
    %c0_59 = arith.constant 0 : index
    %63 = vector.load %arg8[%c0_58, %c0_59] : memref<8x128xf32, #tpu.memory_space<vmem>>, vector<8x128xf32>
    %cst_60 = arith.constant dense<0.000000e+00> : vector<8x128xf32>
    %64 = tpu.matmul %63, %9, %cst_60 {dimension_numbers = #tpu.dot_dimension_numbers<[1], [0], [0], [1], [0, 0, 1, 1], [], []>} : vector<8x128xf32>, vector<128x128xf32>, vector<8x128xf32> -> vector<8x128xf32>
    %65 = arith.addf %62, %64 : vector<8x128xf32>
    %66 = math.tanh %65 : vector<8x128xf32>
    %c0_61 = arith.constant 0 : index
    %c0_62 = arith.constant 0 : index
    %67 = vector.load %arg8[%c0_61, %c0_62] : memref<8x128xf32, #tpu.memory_space<vmem>>, vector<8x128xf32>
    tpu.vector_store %arg8[%c0_61, %c0_62], %66 {strides = array<i32>} : memref<8x128xf32, #tpu.memory_space<vmem>>, vector<8x128xf32>,
    %c7_i32 = arith.constant 7 : i32
    %68 = arith.index_cast %c7_i32 : i32 to index
    %c0_63 = arith.constant 0 : index
    %c0_64 = arith.constant 0 : index
    %69 = vector.load %arg7[%68, %c0_63, %c0_64] : memref<8x8x128xf32, #tpu.memory_space<vmem>>, vector<1x8x128xf32>
    %70 = vector.shape_cast %69 : vector<1x8x128xf32> to vector<8x128xf32>
    %c0_65 = arith.constant 0 : index
    %c0_66 = arith.constant 0 : index
    %71 = vector.load %arg8[%c0_65, %c0_66] : memref<8x128xf32, #tpu.memory_space<vmem>>, vector<8x128xf32>
    %cst_67 = arith.constant dense<0.000000e+00> : vector<8x128xf32>
    %72 = tpu.matmul %71, %9, %cst_67 {dimension_numbers = #tpu.dot_dimension_numbers<[1], [0], [0], [1], [0, 0, 1, 1], [], []>} : vector<8x128xf32>, vector<128x128xf32>, vector<8x128xf32> -> vector<8x128xf32>
    %73 = arith.addf %70, %72 : vector<8x128xf32>
    %74 = math.tanh %73 : vector<8x128xf32>
    %c0_68 = arith.constant 0 : index
    %c0_69 = arith.constant 0 : index
    %75 = vector.load %arg8[%c0_68, %c0_69] : memref<8x128xf32, #tpu.memory_space<vmem>>, vector<8x128xf32>
    tpu.vector_store %arg8[%c0_68, %c0_69], %74 {strides = array<i32>} : memref<8x128xf32, #tpu.memory_space<vmem>>, vector<8x128xf32>,
    %c8_i32 = arith.constant 8 : i32
    %c0_70 = arith.constant 0 : index
    %c0_71 = arith.constant 0 : index
    %76 = vector.load %arg8[%c0_70, %c0_71] : memref<8x128xf32, #tpu.memory_space<vmem>>, vector<8x128xf32>
    %c0_72 = arith.constant 0 : index
    %c0_73 = arith.constant 0 : index
    %77 = vector.load %arg4[%c0_72, %c0_73] : memref<128x128xf32, #tpu.memory_space<vmem>>, vector<128x128xf32>
    %cst_74 = arith.constant dense<0.000000e+00> : vector<8x128xf32>
    %78 = tpu.matmul %76, %77, %cst_74 {dimension_numbers = #tpu.dot_dimension_numbers<[1], [0], [0], [1], [0, 0, 1, 1], [], []>} : vector<8x128xf32>, vector<128x128xf32>, vector<8x128xf32> -> vector<8x128xf32>
    %c0_75 = arith.constant 0 : index
    %c0_76 = arith.constant 0 : index
    %79 = vector.load %arg5[%c0_75, %c0_76] : memref<1x128xf32, #tpu.memory_space<vmem>>, vector<1x128xf32>
    %80 = vector.broadcast %79 : vector<1x128xf32> to vector<8x128xf32>
    %81 = arith.addf %78, %80 : vector<8x128xf32>
    %c0_77 = arith.constant 0 : index
    %c0_78 = arith.constant 0 : index
    %82 = vector.load %arg6[%c0_77, %c0_78] : memref<8x128xf32, #tpu.memory_space<vmem>>, vector<8x128xf32>
    tpu.vector_store %arg6[%c0_77, %c0_78], %81 {strides = array<i32>} : memref<8x128xf32, #tpu.memory_space<vmem>>, vector<8x128xf32>,
    return
  }
}

</mosaic_0001>

<bundles_post_ra>
// kernel: tpu_custom_call.1
= control target key start
LH: loop header
LB: loop body
LE: loop exit
PB: predicated region body
PF: predicated region fallthrough
CT: control target
= control target key end

     0   :  { %11 = vsyncpa [#allocation5], 0  ;;  %s2055_s0 = inlined_call_operand.hbm [shape: f32[8,8,128], index: 0, kind: input, shape index: {}]   ;;  %s2056_s1 = inlined_call_operand.hbm [shape: f32[128,128], index: 1, kind: input, shape index: {}]   ;;  %s2057_s2 = inlined_call_operand.hbm [shape: f32[128,128], index: 2, kind: input, shape index: {}]   ;;  %s2058_s3 = inlined_call_operand.vmem [shape: f32[1,128], index: 3, kind: input, shape index: {}]   ;;  %s2059_s4 = inlined_call_operand.hbm [shape: f32[128,128], index: 4, kind: input, shape index: {}]   ;;  %s2060_s5 = inlined_call_operand.vmem [shape: f32[1,128], index: 5, kind: input, shape index: {}]   ;;  %s2061_s6 = inlined_call_operand.hbm [shape: f32[8,128], index: 6, kind: output, shape index: {}]  }
   0x1   :  { %12 = vsyncpa [#allocation8], 0 }
   0x2   :  { %13 = vsyncpa [#allocation11], 0 }
   0x3   :  { %14 = vsyncpa [#allocation6], 0  ;;  %s1630_s21 = smov [#allocation7]   ;;  %s1631_s23 = smov [#allocation4]  }
   0x4   :  { %s32_s22 = sshll.u32 %s1630_s21, 4  ;;  %s20_s24 = sshll.u32 %s1631_s23, 4  ;;  %s33_s22 = int_to_ptr.vmem [resolvable:$true] %s32_s22  ;;  %s21_s24 = int_to_ptr.vmem [resolvable:$true] %s20_s24 }
   0x5   :  { %s1530_s25 = scalar_lea.vmem %s33_s22, 2048  ;;  %p1535_p1 = scmp.lt.s32.totalorder %s33_s22, %s33_s22 }
   0x6   :  { %p1531_p0 = scmp.ne.s32.totalorder %s33_s22, %s1530_s25  ;;  %p1536_p2 = scmp.lt.s32.totalorder %s1530_s25, %s1530_s25 }
   0x8   :  { %p1537_p3 = por %p1536_p2, %p1535_p1 }
   0xa   :  { %p1538_p4 = pnand %p1537_p3, %p1531_p0 }
   0xc   :  { %1541 = shalt.err (!%p1538_p4)
}
   0xd   :  { %s1632_s26 = smov 128   ;;  %s1633_s27 = smov 8  }
   0xe   :  { %38 = dma.hbm_to_vmem [thread:$0]  %s2056_s1, 2048, %s33_s22, [#allocation8], %s1632_s26, %s1632_s26, %s1633_s27  }
   0xf   :  { %s1550_s30 = scalar_lea.vmem %s21_s24, 1024  ;;  %p1555_p6 = scmp.lt.s32.totalorder %s21_s24, %s21_s24 }
  0x10   :  { %p1551_p5 = scmp.ne.s32.totalorder %s21_s24, %s1550_s30  ;;  %p1556_p7 = scmp.lt.s32.totalorder %s1550_s30, %s1550_s30 }
  0x12   :  { %p1557_p8 = por %p1556_p7, %p1555_p6 }
  0x14   :  { %p1558_p9 = pnand %p1557_p8, %p1551_p5 }
  0x16   :  { %1561 = shalt.err (!%p1558_p9)
}
  0x17   :  { %26 = dma.hbm_to_vmem [thread:$0]  %s2055_s0, 1024, %s21_s24, [#allocation5], %s1632_s26, %s1632_s26, %s1633_s27  }
  0x18   :  { %s1634_s9 = smov [#allocation9]   ;;  %s1635_s11 = smov [#allocation10]  }
  0x19   :  { %s44_s10 = sshll.u32 %s1634_s9, 4  ;;  %s58_s12 = sshll.u32 %s1635_s11, 4  ;;  %s45_s10 = int_to_ptr.vmem [resolvable:$true] %s44_s10  ;;  %s59_s12 = int_to_ptr.vmem [resolvable:$true] %s58_s12 }
  0x1a   :  { %s1570_s1 = scalar_lea.vmem %s45_s10, 2048  ;;  %p1575_p11 = scmp.lt.s32.totalorder %s45_s10, %s45_s10 }
  0x1b   :  { %p1571_p10 = scmp.ne.s32.totalorder %s45_s10, %s1570_s1  ;;  %p1576_p12 = scmp.lt.s32.totalorder %s1570_s1, %s1570_s1 }
  0x1d   :  { %p1577_p13 = por %p1576_p12, %p1575_p11 }
  0x1f   :  { %p1578_p0 = pnand %p1577_p13, %p1571_p10 }
  0x21   :  { %1581 = shalt.err (!%p1578_p0)
}
  0x22   :  { %50 = dma.hbm_to_vmem [thread:$0]  %s2057_s2, 2048, %s45_s10, [#allocation8], %s1632_s26, %s1632_s26, %s1633_s27  }
  0x23   :  { %s1590_s0 = scalar_lea.vmem %s59_s12, 2048  ;;  %p1595_p2 = scmp.lt.s32.totalorder %s59_s12, %s59_s12 }
  0x24   :  { %p1591_p1 = scmp.ne.s32.totalorder %s59_s12, %s1590_s0  ;;  %p1596_p3 = scmp.lt.s32.totalorder %s1590_s0, %s1590_s0 }
  0x26   :  { %p1597_p4 = por %p1596_p3, %p1595_p2 }
  0x28   :  { %p1598_p5 = pnand %p1597_p4, %p1591_p1 }
  0x2a   :  { %1601 = shalt.err (!%p1598_p5)
}
  0x2b   :  { %64 = dma.hbm_to_vmem [thread:$0]  %s2059_s4, 2048, %s59_s12, [#allocation11], %s1632_s26, %s1632_s26, %s1633_s27  }
  0x2c   :  { %1622 = dma.done.wait [#allocation5], 1024  }
  0x2d   :  { %1623 = vsyncadd [#allocation5], 4294966272 }
  0x2e   :  { %1624 = dma.done.wait [#allocation8], 4096  }
  0x2f   :  { %1625 = vsyncadd [#allocation8], 4294963200 }
  0x30   :  { %1626 = dma.done.wait [#allocation11], 2048  }
  0x31   :  { %1627 = vsyncadd [#allocation11], 4294965248  ;;  %v1636_v0 = vmov 0.0   ;;  %vm1637_vm0 = vmmov 0   ;;  %v102_v1 = vld [vmem:[#allocation7 + $0x78] sm:$0xff]  ;;  %v101_v2 = vld [vmem:[#allocation7 + $0x70] sm:$0xff] }
  0x32   :  { %1182 = vmatprep.subr.mxu1 %v1636_v0  ;;  %1214 = vmatprep.mubr.msk.f32.mxu1 %vm1637_vm0, %v1636_v0  ;;  %v1701_v3 = vld [vmem:[#allocation9 + $0x78] sm:$0xff]  ;;  %v1704_v4 = vld [vmem:[#allocation9 + $0x70] sm:$0xff]  ;;  %v100_v5 = vld [vmem:[#allocation7 + $0x68] sm:$0xff]  ;;  %s1638_s18 = smov [#allocation12]  }
  0x33   :  { %1138 = vmatprep.subr.mxu0 %v102_v1  ;;  %1183 = vmatpush3.msra.mxu1 %v1701_v3  ;;  %v1707_v6 = vld [vmem:[#allocation9 + $0x68] sm:$0xff]  ;;  %v99_v7 = vld [vmem:[#allocation7 + $0x60] sm:$0xff]  ;;  %v98_v9 = vld [vmem:[#allocation7 + $0x58] sm:$0xff]  ;;  %s948_s19 = sshll.u32 %s1638_s18, 4  ;;  %s949_s19 = int_to_ptr.vmem [resolvable:$true] %s948_s19 }
  0x34   :  { %1139 = vmatpush3.msra.mxu0 %v102_v1  ;;  %1184 = vmatprep.subr.mxu1 %v1636_v0  ;;  %v1711_v8 = vld [vmem:[#allocation9 + $0x60] sm:$0xff]  ;;  %v1715_v10 = vld [vmem:[#allocation9 + $0x58] sm:$0xff]  ;;  %v97_v11 = vld [vmem:[#allocation7 + $0x50] sm:$0xff]  ;;  %s1602_s20 = scalar_lea.vmem %s949_s19, 128  ;;  %p1607_p7 = scmp.lt.s32.totalorder %s949_s19, %s949_s19 }
  0x35   :  { %1140 = vmatprep.subr.mxu0 %v101_v2  ;;  %1185 = vmatpush3.msra.mxu1 %v1704_v4  ;;  %v1719_v12 = vld [vmem:[#allocation9 + $0x50] sm:$0xff]  ;;  %v96_v13 = vld [vmem:[#allocation7 + $0x48] sm:$0xff]  ;;  %v95_v15 = vld [vmem:[#allocation7 + $0x40] sm:$0xff]  ;;  %p1603_p6 = scmp.ne.s32.totalorder %s949_s19, %s1602_s20  ;;  %p1608_p8 = scmp.lt.s32.totalorder %s1602_s20, %s1602_s20 }
  0x36   :  { %1141 = vmatpush3.msra.mxu0 %v101_v2  ;;  %1186 = vmatprep.subr.mxu1 %v1636_v0  ;;  %v1723_v14 = vld [vmem:[#allocation9 + $0x48] sm:$0xff]  ;;  %v1727_v16 = vld [vmem:[#allocation9 + $0x40] sm:$0xff]  ;;  %v94_v17 = vld [vmem:[#allocation7 + $0x38] sm:$0xff] }
  0x37   :  { %1142 = vmatprep.subr.mxu0 %v100_v5  ;;  %1187 = vmatpush3.msra.mxu1 %v1707_v6  ;;  %v1731_v18 = vld [vmem:[#allocation9 + $0x38] sm:$0xff]  ;;  %v93_v19 = vld [vmem:[#allocation7 + $0x30] sm:$0xff]  ;;  %v92_v21 = vld [vmem:[#allocation7 + $0x28] sm:$0xff]  ;;  %p1609_p9 = por %p1608_p8, %p1607_p7 }
  0x38   :  { %1143 = vmatpush3.msra.mxu0 %v100_v5  ;;  %1188 = vmatprep.subr.mxu1 %v1636_v0  ;;  %v1735_v20 = vld [vmem:[#allocation9 + $0x30] sm:$0xff]  ;;  %v1739_v22 = vld [vmem:[#allocation9 + $0x28] sm:$0xff]  ;;  %v91_v23 = vld [vmem:[#allocation7 + $0x20] sm:$0xff] }
  0x39   :  { %1144 = vmatprep.subr.mxu0 %v99_v7  ;;  %1189 = vmatpush3.msra.mxu1 %v1711_v8  ;;  %v1743_v24 = vld [vmem:[#allocation9 + $0x20] sm:$0xff]  ;;  %v90_v25 = vld [vmem:[#allocation7 + $0x18] sm:$0xff]  ;;  %v89_v27 = vld [vmem:[#allocation7 + $0x10] sm:$0xff]  ;;  %p1610_p10 = pnand %p1609_p9, %p1603_p6 }
  0x3a   :  { %1145 = vmatpush3.msra.mxu0 %v99_v7  ;;  %1190 = vmatprep.subr.mxu1 %v1636_v0  ;;  %v1747_v26 = vld [vmem:[#allocation9 + $0x18] sm:$0xff]  ;;  %v1751_v28 = vld [vmem:[#allocation9 + $0x10] sm:$0xff]  ;;  %v88_v29 = vld [vmem:[#allocation7 + $0x8] sm:$0xff] }
  0x3b   :  { %1146 = vmatprep.subr.mxu0 %v98_v9  ;;  %1191 = vmatpush3.msra.mxu1 %v1715_v10  ;;  %v79_v30 = vld [vmem:[#allocation4] sm:$0xff]  ;;  %v1756_v31 = vld [vmem:[#allocation9 + $0x8] sm:$0xff]  ;;  %v81_v35 = vld [vmem:[#allocation4 + $0x10] sm:$0xff] }
  0x3c   :  { %1147 = vmatpush3.msra.mxu0 %v98_v9  ;;  %1192 = vmatprep.subr.mxu1 %v1636_v0  ;;  %v87_v32 = vld [vmem:[#allocation7] sm:$0xff]  ;;  %v80_v34 = vld [vmem:[#allocation4 + $0x8] sm:$0xff]  ;;  %v82_v36 = vld [vmem:[#allocation4 + $0x18] sm:$0xff] }
  0x3d   :  { %1148 = vmatprep.subr.mxu0 %v97_v11  ;;  %1193 = vmatpush3.msra.mxu1 %v1719_v12  ;;  %v1759_v33 = vld [vmem:[#allocation9] sm:$0xff]  ;;  %v84_v38 = vld [vmem:[#allocation4 + $0x28] sm:$0xff]  ;;  %v85_v39 = vld [vmem:[#allocation4 + $0x30] sm:$0xff] }
  0x3e   :  { %1149 = vmatpush3.msra.mxu0 %v97_v11  ;;  %1194 = vmatprep.subr.mxu1 %v1636_v0  ;;  %v83_v37 = vld [vmem:[#allocation4 + $0x20] sm:$0xff]  ;;  %v86_v40 = vld [vmem:[#allocation4 + $0x38] sm:$0xff] }
  0x3f   :  { %1150 = vmatprep.subr.mxu0 %v96_v13  ;;  %1195 = vmatpush3.msra.mxu1 %v1723_v14  ;;  %v1838_v43 = vld [vmem:[%s2058_s3] ss:$0 sm:$0xff] }
  0x40   :  { %1151 = vmatpush3.msra.mxu0 %v96_v13  ;;  %1196 = vmatprep.subr.mxu1 %v1636_v0 }
  0x41   :  { %1152 = vmatprep.subr.mxu0 %v95_v15  ;;  %1197 = vmatpush3.msra.mxu1 %v1727_v16 }
  0x42   :  { %1153 = vmatpush3.msra.mxu0 %v95_v15  ;;  %1198 = vmatprep.subr.mxu1 %v1636_v0 }
  0x43   :  { %1154 = vmatprep.subr.mxu0 %v94_v17  ;;  %1199 = vmatpush3.msra.mxu1 %v1731_v18 }
  0x44   :  { %1155 = vmatpush3.msra.mxu0 %v94_v17  ;;  %1200 = vmatprep.subr.mxu1 %v1636_v0 }
  0x45   :  { %1156 = vmatprep.subr.mxu0 %v93_v19  ;;  %1201 = vmatpush3.msra.mxu1 %v1735_v20 }
  0x46   :  { %1157 = vmatpush3.msra.mxu0 %v93_v19  ;;  %1202 = vmatprep.subr.mxu1 %v1636_v0 }
  0x47   :  { %1158 = vmatprep.subr.mxu0 %v92_v21  ;;  %1203 = vmatpush3.msra.mxu1 %v1739_v22 }
  0x48   :  { %1159 = vmatpush3.msra.mxu0 %v92_v21  ;;  %1204 = vmatprep.subr.mxu1 %v1636_v0 }
  0x49   :  { %1160 = vmatprep.subr.mxu0 %v91_v23  ;;  %1205 = vmatpush3.msra.mxu1 %v1743_v24 }
  0x4a   :  { %1161 = vmatpush3.msra.mxu0 %v91_v23  ;;  %1206 = vmatprep.subr.mxu1 %v1636_v0  ;;  %v857_v23 = vld [vmem:[#allocation10 + $0x48] sm:$0xff] }
  0x4b   :  { %1162 = vmatprep.subr.mxu0 %v90_v25  ;;  %1207 = vmatpush3.msra.mxu1 %v1747_v26 }
  0x4c   :  { %1163 = vmatpush3.msra.mxu0 %v90_v25  ;;  %1208 = vmatprep.subr.mxu1 %v1636_v0 }
  0x4d   :  { %1164 = vmatprep.subr.mxu0 %v89_v27  ;;  %1209 = vmatpush3.msra.mxu1 %v1751_v28 }
  0x4e   :  { %1165 = vmatpush3.msra.mxu0 %v89_v27  ;;  %1210 = vmatprep.subr.mxu1 %v1636_v0 }
  0x4f   :  { %1166 = vmatprep.subr.mxu0 %v88_v29  ;;  %1170 = vmatprep.mubr.f32.mxu0 %v79_v30  ;;  %v855_v30 = vld [vmem:[#allocation10 + $0x38] sm:$0xff] }
  0x50   :  { %1167 = vmatpush3.msra.mxu0 %v88_v29  ;;  %1211 = vmatpush3.msra.mxu1 %v1756_v31  ;;  %v856_v29 = vld [vmem:[#allocation10 + $0x40] sm:$0xff] }
  0x51   :  { %1168 = vmatprep.subr.mxu0 %v87_v32  ;;  %1212 = vmatprep.subr.mxu1 %v1636_v0 }
  0x52   :  { %1169 = vmatpush3.msra.mxu0 %v87_v32  ;;  %1213 = vmatpush3.msra.mxu1 %v1759_v33  ;;  %v853_v32 = vld [vmem:[#allocation10 + $0x28] sm:$0xff] }
  0x53   :  { %1171 = vmatmul.mubr.f32.vlgmr.msra.gmra.mxu0 %v80_v34  ;;  %1215 = vmatmul.mubr.f32.vlgmr.msra.gmra.mxu1 %v1636_v0  ;;  %v851_v34 = vld [vmem:[#allocation10 + $0x18] sm:$0xff] }
  0x54   :  { %1217 = vmatprep.subr.mxu0 %v1636_v0  ;;  %1252 = vmatprep.subr.mxu1 %v1636_v0 }
  0x55   :  { %1218 = vmatpush3.msra.mxu0 %v1701_v3  ;;  %1253 = vmatpush3.msra.mxu1 %v1701_v3 }
  0x56   :  { %1219 = vmatprep.subr.mxu0 %v1636_v0  ;;  %1254 = vmatprep.subr.mxu1 %v1636_v0 }
  0x57   :  { %1220 = vmatpush3.msra.mxu0 %v1704_v4  ;;  %1255 = vmatpush3.msra.mxu1 %v1704_v4 }
  0x58   :  { %1221 = vmatprep.subr.mxu0 %v1636_v0  ;;  %1256 = vmatprep.subr.mxu1 %v1636_v0 }
  0x59   :  { %1222 = vmatpush3.msra.mxu0 %v1707_v6  ;;  %1257 = vmatpush3.msra.mxu1 %v1707_v6 }
  0x5a   :  { %1223 = vmatprep.subr.mxu0 %v1636_v0  ;;  %1258 = vmatprep.subr.mxu1 %v1636_v0 }
  0x5b   :  { %1224 = vmatpush3.msra.mxu0 %v1711_v8  ;;  %1259 = vmatpush3.msra.mxu1 %v1711_v8 }
  0x5c   :  { %1225 = vmatprep.subr.mxu0 %v1636_v0  ;;  %1260 = vmatprep.subr.mxu1 %v1636_v0 }
  0x5d   :  { %1226 = vmatpush3.msra.mxu0 %v1715_v10  ;;  %1261 = vmatpush3.msra.mxu1 %v1715_v10 }
  0x5e   :  { %1227 = vmatprep.subr.mxu0 %v1636_v0  ;;  %1262 = vmatprep.subr.mxu1 %v1636_v0 }
  0x5f   :  { %1228 = vmatpush3.msra.mxu0 %v1719_v12  ;;  %1263 = vmatpush3.msra.mxu1 %v1719_v12 }
  0x60   :  { %1229 = vmatprep.subr.mxu0 %v1636_v0  ;;  %1264 = vmatprep.subr.mxu1 %v1636_v0 }
  0x61   :  { %1230 = vmatpush3.msra.mxu0 %v1723_v14  ;;  %1265 = vmatpush3.msra.mxu1 %v1723_v14 }
  0x62   :  { %1231 = vmatprep.subr.mxu0 %v1636_v0  ;;  %1266 = vmatprep.subr.mxu1 %v1636_v0 }
  0x63   :  { %1232 = vmatpush3.msra.mxu0 %v1727_v16  ;;  %1267 = vmatpush3.msra.mxu1 %v1727_v16 }
  0x64   :  { %1233 = vmatprep.subr.mxu0 %v1636_v0  ;;  %1268 = vmatprep.subr.mxu1 %v1636_v0 }
  0x65   :  { %1234 = vmatpush3.msra.mxu0 %v1731_v18  ;;  %1269 = vmatpush3.msra.mxu1 %v1731_v18 }
  0x66   :  { %1235 = vmatprep.subr.mxu0 %v1636_v0  ;;  %1270 = vmatprep.subr.mxu1 %v1636_v0 }
  0x67   :  { %1236 = vmatpush3.msra.mxu0 %v1735_v20  ;;  %1271 = vmatpush3.msra.mxu1 %v1735_v20 }
  0x68   :  { %1237 = vmatprep.subr.mxu0 %v1636_v0  ;;  %1272 = vmatprep.subr.mxu1 %v1636_v0 }
  0x69   :  { %1238 = vmatpush3.msra.mxu0 %v1739_v22  ;;  %1273 = vmatpush3.msra.mxu1 %v1739_v22 }
  0x6a   :  { %1239 = vmatprep.subr.mxu0 %v1636_v0  ;;  %1274 = vmatprep.subr.mxu1 %v1636_v0 }
  0x6b   :  { %1240 = vmatpush3.msra.mxu0 %v1743_v24  ;;  %1275 = vmatpush3.msra.mxu1 %v1743_v24 }
  0x6c   :  { %1241 = vmatprep.subr.mxu0 %v1636_v0  ;;  %1276 = vmatprep.subr.mxu1 %v1636_v0 }
  0x6d   :  { %1242 = vmatpush3.msra.mxu0 %v1747_v26  ;;  %1277 = vmatpush3.msra.mxu1 %v1747_v26 }
  0x6e   :  { %1243 = vmatprep.subr.mxu0 %v1636_v0  ;;  %1278 = vmatprep.subr.mxu1 %v1636_v0 }
  0x6f   :  { %1244 = vmatpush3.msra.mxu0 %v1751_v28  ;;  %1279 = vmatpush3.msra.mxu1 %v1751_v28 }
  0x70   :  { %1245 = vmatprep.subr.mxu0 %v1636_v0  ;;  %1280 = vmatprep.subr.mxu1 %v1636_v0 }
  0x71   :  { %1246 = vmatpush3.msra.mxu0 %v1756_v31  ;;  %1281 = vmatpush3.msra.mxu1 %v1756_v31 }
  0x72   :  { %1247 = vmatprep.subr.mxu0 %v1636_v0  ;;  %1282 = vmatprep.subr.mxu1 %v1636_v0 }
  0x73   :  { %1248 = vmatpush3.msra.mxu0 %v1759_v33  ;;  %1283 = vmatpush3.msra.mxu1 %v1759_v33 }
  0x74   :  { %1284 = vmatprep.mubr.msk.f32.mxu1 %vm1637_vm0, %v1636_v0  ;;  %1287 = vmatprep.subr.mxu0 %v1636_v0 }
  0x75   :  { %1322 = vmatprep.subr.mxu1 %v1636_v0  ;;  %1173 = vmatprep.mubr.f32.mxu0 %v81_v35  ;;  %v850_v35 = vld [vmem:[#allocation10 + $0x10] sm:$0xff] }
  0x76   :  { %1174 = vmatmul.mubr.f32.gmra.mxu0 %v82_v36  ;;  %v849_v36 = vld [vmem:[#allocation10 + $0x8] sm:$0xff] }
  0x77   :  { %1176 = vmatprep.mubr.f32.mxu0 %v83_v37  ;;  %v848_v37 = vld [vmem:[#allocation10] sm:$0xff] }
  0x7a   :  { %1177 = vmatmul.mubr.f32.gmra.mxu0 %v84_v38 }
  0x7b   :  { %1179 = vmatprep.mubr.f32.mxu0 %v85_v39 }
  0x7e   :  { %1180 = vmatmul.mubr.f32.gmra.mxu0 %v86_v40 }
  0x7f   :  { %1249 = vmatprep.mubr.msk.f32.mxu0 %vm1637_vm0, %v1636_v0 }
 0x113   :  { %v1172_v41 = vpop.f32.mrf.mxu0  ;;  %v308_v42 = vpop.f32.mrf.mxu1 }
 0x114   :  { %v182_v55 = vadd.f32 %v1172_v41, %v1838_v43 }
 0x115   :  { %v176_v44 = vpop.f32.mrf.mxu0  ;;  %v1216_v45 = vpop.f32.mrf.mxu1 }
 0x116   :  { %v177_v46 = vadd.f32 %v1838_v43, %v176_v44  ;;  %v960_v44 = vld [vmem:[%s2060_s5] ss:$0 sm:$0xff] }
 0x118   :  { %v312_v47 = vadd.f32 %v308_v42, %v177_v46 }
 0x11a   :  { %1506 = vtanh.f32 %v312_v47 }
 0x127   :  { %v1507_v48 = vpop.eup %1506 }
 0x128   :  { %1250 = vmatmul.mubr.f32.vlgmr.msra.gmra.mxu0 %v1507_v48 }
 0x129   :  { %1288 = vmatpush3.msra.mxu0 %v1701_v3  ;;  %1319 = vmatprep.mubr.msk.f32.mxu0 %vm1637_vm0, %v1636_v0 }
 0x12a   :  { %1289 = vmatprep.subr.mxu0 %v1636_v0 }
 0x12b   :  { %1290 = vmatpush3.msra.mxu0 %v1704_v4 }
 0x12c   :  { %1291 = vmatprep.subr.mxu0 %v1636_v0 }
 0x12d   :  { %1292 = vmatpush3.msra.mxu0 %v1707_v6 }
 0x12e   :  { %1293 = vmatprep.subr.mxu0 %v1636_v0 }
 0x12f   :  { %1294 = vmatpush3.msra.mxu0 %v1711_v8 }
 0x130   :  { %1295 = vmatprep.subr.mxu0 %v1636_v0 }
 0x131   :  { %1296 = vmatpush3.msra.mxu0 %v1715_v10 }
 0x132   :  { %1297 = vmatprep.subr.mxu0 %v1636_v0 }
 0x133   :  { %1298 = vmatpush3.msra.mxu0 %v1719_v12 }
 0x134   :  { %1299 = vmatprep.subr.mxu0 %v1636_v0 }
 0x135   :  { %1300 = vmatpush3.msra.mxu0 %v1723_v14 }
 0x136   :  { %1301 = vmatprep.subr.mxu0 %v1636_v0  ;;  %v1875_v49 = vpop.f32.mrf.mxu0 }
 0x137   :  { %1302 = vmatpush3.msra.mxu0 %v1727_v16  ;;  %v192_v2 = vadd.f32 %v1875_v49, %v1838_v43 }
 0x138   :  { %1303 = vmatprep.subr.mxu0 %v1636_v0  ;;  %v186_v50 = vpop.f32.mrf.mxu0 }
 0x139   :  { %1304 = vmatpush3.msra.mxu0 %v1731_v18  ;;  %v187_v60 = vadd.f32 %v1838_v43, %v186_v50 }
 0x13a   :  { %1305 = vmatprep.subr.mxu0 %v1636_v0  ;;  %v1877_v51 = vpop.f32.mrf.mxu0 }
 0x13b   :  { %1306 = vmatpush3.msra.mxu0 %v1735_v20 }
 0x13c   :  { %1307 = vmatprep.subr.mxu0 %v1636_v0  ;;  %v1879_v52 = vpop.f32.mrf.mxu0 }
 0x13d   :  { %1308 = vmatpush3.msra.mxu0 %v1739_v22  ;;  %v197_v13 = vadd.f32 %v1838_v43, %v1879_v52 }
 0x13e   :  { %1309 = vmatprep.subr.mxu0 %v1636_v0  ;;  %v1881_v53 = vpop.f32.mrf.mxu0 }
 0x13f   :  { %1310 = vmatpush3.msra.mxu0 %v1743_v24  ;;  %v212_v38 = vadd.f32 %v1881_v53, %v1838_v43 }
 0x140   :  { %1311 = vmatprep.subr.mxu0 %v1636_v0  ;;  %v1883_v54 = vpop.f32.mrf.mxu0 }
 0x141   :  { %1312 = vmatpush3.msra.mxu0 %v1747_v26 }
 0x142   :  { %1313 = vmatprep.subr.mxu0 %v1636_v0 }
 0x143   :  { %1314 = vmatpush3.msra.mxu0 %v1751_v28 }
 0x144   :  { %1315 = vmatprep.subr.mxu0 %v1636_v0 }
 0x145   :  { %1316 = vmatpush3.msra.mxu0 %v1756_v31 }
 0x146   :  { %1317 = vmatprep.subr.mxu0 %v1636_v0 }
 0x147   :  { %1318 = vmatpush3.msra.mxu0 %v1759_v33 }
 0x148   :  { %1357 = vmatprep.subr.mxu0 %v1636_v0 }
 0x1e8   :  { %v384_v56 = vpop.f32.mrf.mxu0 }
 0x1e9   :  { %v388_v57 = vadd.f32 %v384_v56, %v182_v55 }
 0x1ea   :  { %v1251_v58 = vpop.f32.mrf.mxu0 }
 0x1eb   :  { %1508 = vtanh.f32 %v388_v57 }
 0x1f8   :  { %v1509_v59 = vpop.eup %1508 }
 0x1f9   :  { %1285 = vmatmul.mubr.f32.vlgmr.msra.gmra.mxu1 %v1509_v59 }
 0x1fa   :  { %1323 = vmatpush3.msra.mxu1 %v1701_v3  ;;  %1354 = vmatprep.mubr.msk.f32.mxu1 %vm1637_vm0, %v1636_v0 }
 0x1fb   :  { %1324 = vmatprep.subr.mxu1 %v1636_v0 }
 0x1fc   :  { %1325 = vmatpush3.msra.mxu1 %v1704_v4 }
 0x1fd   :  { %1326 = vmatprep.subr.mxu1 %v1636_v0 }
 0x1fe   :  { %1327 = vmatpush3.msra.mxu1 %v1707_v6 }
 0x1ff   :  { %1328 = vmatprep.subr.mxu1 %v1636_v0 }
 0x200   :  { %1329 = vmatpush3.msra.mxu1 %v1711_v8 }
 0x201   :  { %1330 = vmatprep.subr.mxu1 %v1636_v0 }
 0x202   :  { %1331 = vmatpush3.msra.mxu1 %v1715_v10 }
 0x203   :  { %1332 = vmatprep.subr.mxu1 %v1636_v0 }
 0x204   :  { %1333 = vmatpush3.msra.mxu1 %v1719_v12 }
 0x205   :  { %1334 = vmatprep.subr.mxu1 %v1636_v0 }
 0x206   :  { %1335 = vmatpush3.msra.mxu1 %v1723_v14 }
 0x207   :  { %1336 = vmatprep.subr.mxu1 %v1636_v0 }
 0x208   :  { %1337 = vmatpush3.msra.mxu1 %v1727_v16 }
 0x209   :  { %1338 = vmatprep.subr.mxu1 %v1636_v0 }
 0x20a   :  { %1339 = vmatpush3.msra.mxu1 %v1731_v18 }
 0x20b   :  { %1340 = vmatprep.subr.mxu1 %v1636_v0 }
 0x20c   :  { %1341 = vmatpush3.msra.mxu1 %v1735_v20 }
 0x20d   :  { %1342 = vmatprep.subr.mxu1 %v1636_v0 }
 0x20e   :  { %1343 = vmatpush3.msra.mxu1 %v1739_v22 }
 0x20f   :  { %1344 = vmatprep.subr.mxu1 %v1636_v0 }
 0x210   :  { %1345 = vmatpush3.msra.mxu1 %v1743_v24 }
 0x211   :  { %1346 = vmatprep.subr.mxu1 %v1636_v0 }
 0x212   :  { %1347 = vmatpush3.msra.mxu1 %v1747_v26 }
 0x213   :  { %1348 = vmatprep.subr.mxu1 %v1636_v0 }
 0x214   :  { %1349 = vmatpush3.msra.mxu1 %v1751_v28 }
 0x215   :  { %1350 = vmatprep.subr.mxu1 %v1636_v0 }
 0x216   :  { %1351 = vmatpush3.msra.mxu1 %v1756_v31 }
 0x217   :  { %1352 = vmatprep.subr.mxu1 %v1636_v0 }
 0x218   :  { %1353 = vmatpush3.msra.mxu1 %v1759_v33 }
 0x219   :  { %1392 = vmatprep.subr.mxu1 %v1636_v0 }
 0x2b9   :  { %v460_v61 = vpop.f32.mrf.mxu1 }
 0x2ba   :  { %v464_v62 = vadd.f32 %v460_v61, %v187_v60 }
 0x2bb   :  { %v1286_v63 = vpop.f32.mrf.mxu1 }
 0x2bc   :  { %1510 = vtanh.f32 %v464_v62 }
 0x2c9   :  { %v1511_v1 = vpop.eup %1510 }
 0x2ca   :  { %1320 = vmatmul.mubr.f32.vlgmr.msra.gmra.mxu0 %v1511_v1 }
 0x2cb   :  { %1358 = vmatpush3.msra.mxu0 %v1701_v3  ;;  %1389 = vmatprep.mubr.msk.f32.mxu0 %vm1637_vm0, %v1636_v0 }
 0x2cc   :  { %1359 = vmatprep.subr.mxu0 %v1636_v0 }
 0x2cd   :  { %1360 = vmatpush3.msra.mxu0 %v1704_v4 }
 0x2ce   :  { %1361 = vmatprep.subr.mxu0 %v1636_v0 }
 0x2cf   :  { %1362 = vmatpush3.msra.mxu0 %v1707_v6 }
 0x2d0   :  { %1363 = vmatprep.subr.mxu0 %v1636_v0 }
 0x2d1   :  { %1364 = vmatpush3.msra.mxu0 %v1711_v8 }
 0x2d2   :  { %1365 = vmatprep.subr.mxu0 %v1636_v0 }
 0x2d3   :  { %1366 = vmatpush3.msra.mxu0 %v1715_v10 }
 0x2d4   :  { %1367 = vmatprep.subr.mxu0 %v1636_v0 }
 0x2d5   :  { %1368 = vmatpush3.msra.mxu0 %v1719_v12 }
 0x2d6   :  { %1369 = vmatprep.subr.mxu0 %v1636_v0 }
 0x2d7   :  { %1370 = vmatpush3.msra.mxu0 %v1723_v14 }
 0x2d8   :  { %1371 = vmatprep.subr.mxu0 %v1636_v0 }
 0x2d9   :  { %1372 = vmatpush3.msra.mxu0 %v1727_v16 }
 0x2da   :  { %1373 = vmatprep.subr.mxu0 %v1636_v0 }
 0x2db   :  { %1374 = vmatpush3.msra.mxu0 %v1731_v18 }
 0x2dc   :  { %1375 = vmatprep.subr.mxu0 %v1636_v0 }
 0x2dd   :  { %1376 = vmatpush3.msra.mxu0 %v1735_v20 }
 0x2de   :  { %1377 = vmatprep.subr.mxu0 %v1636_v0 }
 0x2df   :  { %1378 = vmatpush3.msra.mxu0 %v1739_v22 }
 0x2e0   :  { %1379 = vmatprep.subr.mxu0 %v1636_v0 }
 0x2e1   :  { %1380 = vmatpush3.msra.mxu0 %v1743_v24 }
 0x2e2   :  { %1381 = vmatprep.subr.mxu0 %v1636_v0 }
 0x2e3   :  { %1382 = vmatpush3.msra.mxu0 %v1747_v26 }
 0x2e4   :  { %1383 = vmatprep.subr.mxu0 %v1636_v0 }
 0x2e5   :  { %1384 = vmatpush3.msra.mxu0 %v1751_v28 }
 0x2e6   :  { %1385 = vmatprep.subr.mxu0 %v1636_v0 }
 0x2e7   :  { %1386 = vmatpush3.msra.mxu0 %v1756_v31 }
 0x2e8   :  { %1387 = vmatprep.subr.mxu0 %v1636_v0 }
 0x2e9   :  { %1388 = vmatpush3.msra.mxu0 %v1759_v33 }
 0x2ea   :  { %1427 = vmatprep.subr.mxu0 %v1636_v0 }
 0x38a   :  { %v536_v5 = vpop.f32.mrf.mxu0 }
 0x38b   :  { %v540_v7 = vadd.f32 %v536_v5, %v192_v2 }
 0x38c   :  { %v1321_v9 = vpop.f32.mrf.mxu0 }
 0x38d   :  { %1512 = vtanh.f32 %v540_v7 }
 0x39a   :  { %v1513_v11 = vpop.eup %1512 }
 0x39b   :  { %1355 = vmatmul.mubr.f32.vlgmr.msra.gmra.mxu1 %v1513_v11 }
 0x39c   :  { %1393 = vmatpush3.msra.mxu1 %v1701_v3  ;;  %1424 = vmatprep.mubr.msk.f32.mxu1 %vm1637_vm0, %v1636_v0 }
 0x39d   :  { %1394 = vmatprep.subr.mxu1 %v1636_v0 }
 0x39e   :  { %1395 = vmatpush3.msra.mxu1 %v1704_v4 }
 0x39f   :  { %1396 = vmatprep.subr.mxu1 %v1636_v0 }
 0x3a0   :  { %1397 = vmatpush3.msra.mxu1 %v1707_v6 }
 0x3a1   :  { %1398 = vmatprep.subr.mxu1 %v1636_v0 }
 0x3a2   :  { %1399 = vmatpush3.msra.mxu1 %v1711_v8 }
 0x3a3   :  { %1400 = vmatprep.subr.mxu1 %v1636_v0 }
 0x3a4   :  { %1401 = vmatpush3.msra.mxu1 %v1715_v10 }
 0x3a5   :  { %1402 = vmatprep.subr.mxu1 %v1636_v0 }
 0x3a6   :  { %1403 = vmatpush3.msra.mxu1 %v1719_v12 }
 0x3a7   :  { %1404 = vmatprep.subr.mxu1 %v1636_v0 }
 0x3a8   :  { %1405 = vmatpush3.msra.mxu1 %v1723_v14 }
 0x3a9   :  { %1406 = vmatprep.subr.mxu1 %v1636_v0 }
 0x3aa   :  { %1407 = vmatpush3.msra.mxu1 %v1727_v16 }
 0x3ab   :  { %1408 = vmatprep.subr.mxu1 %v1636_v0 }
 0x3ac   :  { %1409 = vmatpush3.msra.mxu1 %v1731_v18 }
 0x3ad   :  { %1410 = vmatprep.subr.mxu1 %v1636_v0 }
 0x3ae   :  { %1411 = vmatpush3.msra.mxu1 %v1735_v20 }
 0x3af   :  { %1412 = vmatprep.subr.mxu1 %v1636_v0 }
 0x3b0   :  { %1413 = vmatpush3.msra.mxu1 %v1739_v22 }
 0x3b1   :  { %1414 = vmatprep.subr.mxu1 %v1636_v0 }
 0x3b2   :  { %1415 = vmatpush3.msra.mxu1 %v1743_v24 }
 0x3b3   :  { %1416 = vmatprep.subr.mxu1 %v1636_v0 }
 0x3b4   :  { %1417 = vmatpush3.msra.mxu1 %v1747_v26 }
 0x3b5   :  { %1418 = vmatprep.subr.mxu1 %v1636_v0 }
 0x3b6   :  { %1419 = vmatpush3.msra.mxu1 %v1751_v28 }
 0x3b7   :  { %1420 = vmatprep.subr.mxu1 %v1636_v0 }
 0x3b8   :  { %1421 = vmatpush3.msra.mxu1 %v1756_v31 }
 0x3b9   :  { %1422 = vmatprep.subr.mxu1 %v1636_v0 }
 0x3ba   :  { %1423 = vmatpush3.msra.mxu1 %v1759_v33 }
 0x3bb   :  { %1462 = vmatprep.subr.mxu1 %v1636_v0 }
 0x45b   :  { %v612_v15 = vpop.f32.mrf.mxu1 }
 0x45c   :  { %v616_v17 = vadd.f32 %v612_v15, %v197_v13 }
 0x45d   :  { %v1356_v19 = vpop.f32.mrf.mxu1 }
 0x45e   :  { %1514 = vtanh.f32 %v616_v17 }
 0x46b   :  { %v1515_v21 = vpop.eup %1514 }
 0x46c   :  { %1390 = vmatmul.mubr.f32.vlgmr.msra.gmra.mxu0 %v1515_v21 }
 0x46d   :  { %1428 = vmatpush3.msra.mxu0 %v1701_v3  ;;  %1459 = vmatprep.mubr.msk.f32.mxu0 %vm1637_vm0, %v1636_v0  ;;  %v202_v3 = vadd.f32 %v1877_v51, %v1838_v43 }
 0x46e   :  { %1429 = vmatprep.subr.mxu0 %v1636_v0 }
 0x46f   :  { %1430 = vmatpush3.msra.mxu0 %v1704_v4 }
 0x470   :  { %1431 = vmatprep.subr.mxu0 %v1636_v0 }
 0x471   :  { %1432 = vmatpush3.msra.mxu0 %v1707_v6 }
 0x472   :  { %1433 = vmatprep.subr.mxu0 %v1636_v0 }
 0x473   :  { %1434 = vmatpush3.msra.mxu0 %v1711_v8 }
 0x474   :  { %1435 = vmatprep.subr.mxu0 %v1636_v0 }
 0x475   :  { %1436 = vmatpush3.msra.mxu0 %v1715_v10 }
 0x476   :  { %1437 = vmatprep.subr.mxu0 %v1636_v0 }
 0x477   :  { %1438 = vmatpush3.msra.mxu0 %v1719_v12  ;;  %v863_v12 = vld [vmem:[#allocation10 + $0x78] sm:$0xff] }
 0x478   :  { %1439 = vmatprep.subr.mxu0 %v1636_v0 }
 0x479   :  { %1440 = vmatpush3.msra.mxu0 %v1723_v14  ;;  %v862_v14 = vld [vmem:[#allocation10 + $0x70] sm:$0xff] }
 0x47a   :  { %1441 = vmatprep.subr.mxu0 %v1636_v0 }
 0x47b   :  { %1442 = vmatpush3.msra.mxu0 %v1727_v16  ;;  %v861_v16 = vld [vmem:[#allocation10 + $0x68] sm:$0xff] }
 0x47c   :  { %1443 = vmatprep.subr.mxu0 %v1636_v0 }
 0x47d   :  { %1444 = vmatpush3.msra.mxu0 %v1731_v18  ;;  %v860_v18 = vld [vmem:[#allocation10 + $0x60] sm:$0xff] }
 0x47e   :  { %1445 = vmatprep.subr.mxu0 %v1636_v0 }
 0x47f   :  { %1446 = vmatpush3.msra.mxu0 %v1735_v20  ;;  %v859_v20 = vld [vmem:[#allocation10 + $0x58] sm:$0xff] }
 0x480   :  { %1447 = vmatprep.subr.mxu0 %v1636_v0 }
 0x481   :  { %1448 = vmatpush3.msra.mxu0 %v1739_v22  ;;  %v858_v22 = vld [vmem:[#allocation10 + $0x50] sm:$0xff] }
 0x482   :  { %1449 = vmatprep.subr.mxu0 %v1636_v0 }
 0x483   :  { %1450 = vmatpush3.msra.mxu0 %v1743_v24  ;;  %v207_v24 = vadd.f32 %v1838_v43, %v1883_v54 }
 0x484   :  { %1451 = vmatprep.subr.mxu0 %v1636_v0 }
 0x485   :  { %1452 = vmatpush3.msra.mxu0 %v1747_v26 }
 0x486   :  { %1453 = vmatprep.subr.mxu0 %v1636_v0 }
 0x487   :  { %1454 = vmatpush3.msra.mxu0 %v1751_v28 }
 0x488   :  { %1455 = vmatprep.subr.mxu0 %v1636_v0 }
 0x489   :  { %1456 = vmatpush3.msra.mxu0 %v1756_v31  ;;  %v854_v31 = vld [vmem:[#allocation10 + $0x30] sm:$0xff] }
 0x48a   :  { %1457 = vmatprep.subr.mxu0 %v1636_v0 }
 0x48b   :  { %1458 = vmatpush3.msra.mxu0 %v1759_v33  ;;  %v852_v33 = vld [vmem:[#allocation10 + $0x20] sm:$0xff] }
 0x52c   :  { %v688_v4 = vpop.f32.mrf.mxu0 }
 0x52d   :  { %v692_v6 = vadd.f32 %v688_v4, %v202_v3 }
 0x52e   :  { %v1391_v8 = vpop.f32.mrf.mxu0 }
 0x52f   :  { %1516 = vtanh.f32 %v692_v6 }
 0x53c   :  { %v1517_v10 = vpop.eup %1516 }
 0x53d   :  { %1425 = vmatmul.mubr.f32.vlgmr.msra.gmra.mxu1 %v1517_v10 }
 0x53e   :  { %1494 = vmatprep.mubr.msk.f32.mxu1 %vm1637_vm0, %v1636_v0  ;;  %1463 = vmatpush3.msra.mxu1 %v863_v12 }
 0x53f   :  { %1464 = vmatprep.subr.mxu1 %v1636_v0 }
 0x540   :  { %1465 = vmatpush3.msra.mxu1 %v862_v14 }
 0x541   :  { %1466 = vmatprep.subr.mxu1 %v1636_v0 }
 0x542   :  { %1467 = vmatpush3.msra.mxu1 %v861_v16 }
 0x543   :  { %1468 = vmatprep.subr.mxu1 %v1636_v0 }
 0x544   :  { %1469 = vmatpush3.msra.mxu1 %v860_v18 }
 0x545   :  { %1470 = vmatprep.subr.mxu1 %v1636_v0 }
 0x546   :  { %1471 = vmatpush3.msra.mxu1 %v859_v20 }
 0x547   :  { %1472 = vmatprep.subr.mxu1 %v1636_v0 }
 0x548   :  { %1473 = vmatpush3.msra.mxu1 %v858_v22 }
 0x549   :  { %1474 = vmatprep.subr.mxu1 %v1636_v0 }
 0x54a   :  { %1475 = vmatpush3.msra.mxu1 %v857_v23 }
 0x54b   :  { %1476 = vmatprep.subr.mxu1 %v1636_v0 }
 0x54c   :  { %1477 = vmatpush3.msra.mxu1 %v856_v29 }
 0x54d   :  { %1478 = vmatprep.subr.mxu1 %v1636_v0 }
 0x54e   :  { %1479 = vmatpush3.msra.mxu1 %v855_v30 }
 0x54f   :  { %1480 = vmatprep.subr.mxu1 %v1636_v0 }
 0x550   :  { %1481 = vmatpush3.msra.mxu1 %v854_v31 }
 0x551   :  { %1482 = vmatprep.subr.mxu1 %v1636_v0 }
 0x552   :  { %1483 = vmatpush3.msra.mxu1 %v853_v32 }
 0x553   :  { %1484 = vmatprep.subr.mxu1 %v1636_v0 }
 0x554   :  { %1485 = vmatpush3.msra.mxu1 %v852_v33 }
 0x555   :  { %1486 = vmatprep.subr.mxu1 %v1636_v0 }
 0x556   :  { %1487 = vmatpush3.msra.mxu1 %v851_v34 }
 0x557   :  { %1488 = vmatprep.subr.mxu1 %v1636_v0 }
 0x558   :  { %1489 = vmatpush3.msra.mxu1 %v850_v35 }
 0x559   :  { %1490 = vmatprep.subr.mxu1 %v1636_v0 }
 0x55a   :  { %1491 = vmatpush3.msra.mxu1 %v849_v36 }
 0x55b   :  { %1492 = vmatprep.subr.mxu1 %v1636_v0 }
 0x55c   :  { %1493 = vmatpush3.msra.mxu1 %v848_v37 }
 0x5fd   :  { %v764_v25 = vpop.f32.mrf.mxu1 }
 0x5fe   :  { %v768_v26 = vadd.f32 %v764_v25, %v207_v24 }
 0x5ff   :  { %v1426_v27 = vpop.f32.mrf.mxu1 }
 0x600   :  { %1518 = vtanh.f32 %v768_v26 }
 0x60d   :  { %v1519_v28 = vpop.eup %1518 }
 0x60e   :  { %1460 = vmatmul.mubr.f32.vlgmr.msra.gmra.mxu0 %v1519_v28 }
 0x6ce   :  { %v840_v39 = vpop.f32.mrf.mxu0 }
 0x6cf   :  { %v844_v40 = vadd.f32 %v840_v39, %v212_v38 }
 0x6d0   :  { %v1461_v41 = vpop.f32.mrf.mxu0 }
 0x6d1   :  { %1520 = vtanh.f32 %v844_v40 }
 0x6de   :  { %v1521_v42 = vpop.eup %1520 }
 0x6df   :  { %1495 = vmatmul.mubr.f32.vlgmr.msra.gmra.mxu1 %v1521_v42 }
 0x79f   :  { %v937_v45 = vpop.f32.mrf.mxu1 }
 0x7a0   :  { %v938_v46 = vadd.f32 %v960_v44, %v937_v45 }
 0x7a1   :  { %v1496_v0 = vpop.f32.mrf.mxu1 }
 0x7a2   :  { %941 = vst [vmem:[#allocation12] sm:$0xff] %v938_v46 }
 0x7a3   :  { %1613 = shalt.err (!%p1610_p10)
}
 0x7a4   :  { %951 = dma.vmem_to_hbm [thread:$0]  %s949_s19, 128, %s2061_s6, [#allocation6]  }
 0x7a5   :  { %1628 = dma.done.wait [#allocation6], 128  }
 0x7a6   :  { %1629 = vsyncadd [#allocation6], 4294967168 }
 0x7a7   :  { %955 = vsyncpa [#allocation5], 1 }
 0x7a8   :  { %956 = vsyncpa [#allocation8], 1 }
 0x7a9   :  { %957 = vsyncpa [#allocation11], 1 }
 0x7aa   :  { %958 = vsyncpa [#allocation6], 1 }

</bundles_post_ra>
